<compile_context>
chip_gen: v7x
topology: tpu7x:2x2x1
jax: 0.10.0
libtpu: 0.0.40
codegen_flags: <defaults>
</compile_context>

<pallas_src>
import functools

import jax
import jax.numpy as jnp
from jax.experimental import pallas as pl
from jax.experimental.pallas import tpu as pltpu


_F32_TEMPS = 5            # ~peak simultaneously-live full-tile f32 temporaries in the kernel
_PER_BLOCK_CAP = 8 << 20  # per-input-block DMA chunk cap (multi-MiB but bounded)


def _vmem_capacity_bytes() -> int:
    """Physical per-core VMEM; conservative fallback if the query is unavailable."""
    try:
        return int(pltpu.get_tpu_info().vmem_capacity_bytes)
    except Exception:
        return 64 << 20   # v7x per-TC VMEM (the smallest of supported generations)


def _pick_tile_b(B: int, C: int, itemsize: int) -> int:
    cap = _vmem_capacity_bytes()
    budget = int(cap * 0.6)                               # headroom for spill / misc scratch
    # 2 inputs x 2 pipeline buffers in input dtype + ~5 full-tile f32 compute temporaries.
    per_row = 4 * C * itemsize + _F32_TEMPS * C * 4
    max_rows = max(budget // max(per_row, 1), 1)
    # Byte-based per-input-block cap (replaces fixed 2048-row cap).
    max_rows = min(max_rows, max(_PER_BLOCK_CAP // max(C * itemsize, 1), 1))
    tb = min(B, max_rows)
    # Align TB to the dtype's sublane packing (f32: 8, bf16: 16, int8/fp8: 32).
    align = {4: 8, 2: 16, 1: 32}.get(itemsize, 8)
    if tb >= align:
        tb = (tb // align) * align
    else:
        tb = B                                            # full-array block dim is also legal
    return max(tb, 1)


def _vmem_limit_bytes(TB: int, C: int, itemsize: int) -> int:
    cap = _vmem_capacity_bytes()
    pipeline = 4 * TB * C * itemsize                      # 2 inputs x 2 pipeline buffers
    compute = _F32_TEMPS * TB * C * 4                     # in-kernel f32 temporaries
    limit = pipeline + compute + (4 << 20)
    return int(min(max(limit, 16 << 20), int(cap * 0.75)))


def _distill_kernel(s_ref, t_ref, tgt_ref, out_ref, *, inv_t, temperature, batch, tile_b):
    i = pl.program_id(0)
    s = s_ref[...].astype(jnp.float32)            # [TB, C] student logits
    t = t_ref[...].astype(jnp.float32)            # [TB, C] teacher logits
    tgt = tgt_ref[...]                            # [TB, 1] int32 labels
    TB, C = s.shape

    # ---- soft loss first (consume its big temporaries before the hard branch) --------
    # KL(softmax(t/T) || softmax(s/T)) per row, using sum(pt) == 1:
    #   KL = sum(pt * (tT - sT)) + lse(sT) - lse(tT)
    sT = s * inv_t
    tT = t * inv_t
    diff = tT - sT                                # single subtract, reuses sT/tT

    mt = jnp.max(tT, axis=1, keepdims=True)
    et = jnp.exp(tT - mt)                                                    # [TB, C]
    sum_et = jnp.sum(et, axis=1, keepdims=True)                              # [TB, 1]
    lse_t = mt + jnp.log(sum_et)
    cross = jnp.sum(et * diff, axis=1, keepdims=True) / sum_et               # sum(pt*(tT-sT))

    ms = jnp.max(sT, axis=1, keepdims=True)
    es = jnp.exp(sT - ms)                                                    # [TB, C]
    lse_s = ms + jnp.log(jnp.sum(es, axis=1, keepdims=True))

    kl_rows = cross + lse_s - lse_t                                          # [TB, 1]

    # ---- hard loss: per-row cross-entropy on raw student logits ----------------------
    # Per-row shift for LSE stability derived from the soft max (argmax identical, inv_t>0).
    if temperature == 2.0:
        # exp(s - 2*ms) == exp(sT - ms)^2  -> reuse es, no third exp pass
        lse = 2.0 * ms + jnp.log(jnp.sum(es * es, axis=1, keepdims=True))
    else:
        m = ms / inv_t
        lse = m + jnp.log(jnp.sum(jnp.exp(s - m), axis=1, keepdims=True))
    class_ids = jax.lax.broadcasted_iota(jnp.int32, (TB, C), 1)
    s_at_tgt = jnp.sum(jnp.where(class_ids == tgt, s, 0.0), axis=1, keepdims=True)
    hard_rows = lse - s_at_tgt                                               # [TB, 1]

    # ---- padded-row masking: row-level only (per-row reductions can't leak garbage) --
    need_mask = (batch % tile_b) != 0             # static (trace-time) condition
    if need_mask:
        row_ids = i * tile_b + jax.lax.broadcasted_iota(jnp.int32, (TB, 1), 0)
        valid = row_ids < batch                   # [TB, 1]
        hard_rows = jnp.where(valid, hard_rows, 0.0)
        kl_rows = jnp.where(valid, kl_rows, 0.0)

    hard = jnp.sum(hard_rows)
    kl = jnp.sum(kl_rows)

    # Lane-dense, (8,128)-aligned per-tile partials: sublane 0 = hard_sum, sublane 1 = kl_sum.
    sub = jax.lax.broadcasted_iota(jnp.int32, (8, 128), 0)
    out_ref[0] = jnp.where(sub == 0, hard, jnp.where(sub == 1, kl, 0.0))


def distillation_loss(student_logits, targets, teacher_logits,
                      alpha: float = 0.5, temperature: float = 2.0):
    """Pallas equivalent of DistillationLoss.forward. Returns a scalar f32."""
    B, C = student_logits.shape
    itemsize = jnp.dtype(student_logits.dtype).itemsize
    TB = _pick_tile_b(B, C, itemsize)
    num_tiles = pl.cdiv(B, TB)
    tgt2d = targets.astype(jnp.int32).reshape(B, 1)

    kernel = functools.partial(_distill_kernel,
                               inv_t=1.0 / float(temperature),
                               temperature=float(temperature),
                               batch=B, tile_b=TB)

    partials = pl.pallas_call(
        kernel,
        out_shape=jax.ShapeDtypeStruct((num_tiles, 8, 128), jnp.float32),
        grid=(num_tiles,),
        in_specs=[
            pl.BlockSpec((TB, C), lambda i: (i, 0)),   # student logits tile
            pl.BlockSpec((TB, C), lambda i: (i, 0)),   # teacher logits tile
            pl.BlockSpec((TB, 1), lambda i: (i, 0)),   # targets tile
        ],
        out_specs=pl.BlockSpec((1, 8, 128), lambda i: (i, 0, 0)),
        compiler_params=pltpu.CompilerParams(
            dimension_semantics=("parallel",),         # v7x: shard batch tiles across both TCs
            vmem_limit_bytes=_vmem_limit_bytes(TB, C, itemsize),
        ),
    )(student_logits, teacher_logits, tgt2d)

    hard_sum = jnp.sum(partials[:, 0, 0])
    kl_sum = jnp.sum(partials[:, 1, 0])
    T = float(temperature)
    hard_loss = hard_sum / B
    soft_loss = (kl_sum / B) * (T * T)                 # batchmean * T^2
    return (1.0 - float(alpha)) * hard_loss + float(alpha) * soft_loss


def _reference(student, targets, teacher, alpha=0.5, temperature=2.0):
    # pure-JAX reference matching PyTorch semantics
    log_p = jax.nn.log_softmax(student, axis=1)
    hard = -jnp.mean(jnp.take_along_axis(log_p, targets[:, None], axis=1))
    log_ps = jax.nn.log_softmax(student / temperature, axis=1)
    pt = jax.nn.softmax(teacher / temperature, axis=1)
    soft = jnp.sum(pt * (jnp.log(pt) - log_ps)) / student.shape[0] * temperature ** 2
    return (1 - alpha) * hard + alpha * soft


if __name__ == "__main__":
    key = jax.random.PRNGKey(0)
    # Case (B=13) exercises multi-tile grid + padded-row masking; T=3.0 case exercises
    # the generic (non-squared) hard-loss LSE path.
    cases = [(8, 32, 2.0), (13, 32, 2.0), (13, 32, 3.0)]
    for case_idx, (B, C, T) in enumerate(cases):
        ck = jax.random.fold_in(key, case_idx)
        k1, k2, k3 = jax.random.split(ck, 3)
        student = jax.random.normal(k1, (B, C), dtype=jnp.float32)
        teacher = jax.random.normal(k2, (B, C), dtype=jnp.float32)
        targets = jax.random.randint(k3, (B,), 0, C, dtype=jnp.int32)

        loss = distillation_loss(student, targets, teacher, alpha=0.5, temperature=T)
        loss = jax.block_until_ready(loss)

        ref = _reference(student, targets, teacher, alpha=0.5, temperature=T)
        assert jnp.allclose(loss, ref, atol=1e-4, rtol=1e-4), (B, C, T, loss, ref)

    print("KERNEL_OK")
</pallas_src>

<mosaic_0001>
module attributes {stable_mosaic.version = 11 : i64} {
  func.func @_distill_kernel(%arg0: i32, %arg1: memref<8x32xf32, #tpu.memory_space<vmem>>, %arg2: memref<8x32xf32, #tpu.memory_space<vmem>>, %arg3: memref<8x1xi32, #tpu.memory_space<vmem>>, %arg4: memref<1x8x128xf32, #tpu.memory_space<vmem>>) attributes {dimension_semantics = [#tpu.dimension_semantics<parallel>], iteration_bounds = array<i64: 1>, scalar_prefetch = 0 : i64, scratch_operands = 0 : i64, tpu.core_type = #tpu.core_type<tc>, window_params = [{transform_indices = @transform_0, window_bounds = array<i64: 8, 32>}, {transform_indices = @transform_1, window_bounds = array<i64: 8, 32>}, {transform_indices = @transform_2, window_bounds = array<i64: 8, 1>}, {transform_indices = @transform_3, window_bounds = array<i64: 1, 8, 128>}]} {
    %c0 = arith.constant 0 : index
    %c0_0 = arith.constant 0 : index
    %0 = vector.load %arg1[%c0, %c0_0] : memref<8x32xf32, #tpu.memory_space<vmem>>, vector<8x32xf32>
    %c0_1 = arith.constant 0 : index
    %c0_2 = arith.constant 0 : index
    %1 = vector.load %arg2[%c0_1, %c0_2] : memref<8x32xf32, #tpu.memory_space<vmem>>, vector<8x32xf32>
    %c0_3 = arith.constant 0 : index
    %c0_4 = arith.constant 0 : index
    %2 = vector.load %arg3[%c0_3, %c0_4] : memref<8x1xi32, #tpu.memory_space<vmem>>, vector<8x1xi32>
    %cst = arith.constant 5.000000e-01 : f32
    %3 = vector.broadcast %cst : f32 to vector<8x32xf32>
    %4 = arith.mulf %0, %3 : vector<8x32xf32>
    %cst_5 = arith.constant 5.000000e-01 : f32
    %5 = vector.broadcast %cst_5 : f32 to vector<8x32xf32>
    %6 = arith.mulf %1, %5 : vector<8x32xf32>
    %7 = arith.subf %6, %4 : vector<8x32xf32>
    %cst_6 = arith.constant dense<0xFF800000> : vector<8xf32>
    %8 = vector.multi_reduction <maximumf>, %6, %cst_6 [1] : vector<8x32xf32> to vector<8xf32>
    %9 = vector.shape_cast %8 : vector<8xf32> to vector<8x1xf32>
    %10 = vector.broadcast %9 : vector<8x1xf32> to vector<8x32xf32>
    %11 = arith.subf %6, %10 : vector<8x32xf32>
    %12 = math.exp %11 : vector<8x32xf32>
    %cst_7 = arith.constant dense<0.000000e+00> : vector<8xf32>
    %13 = vector.multi_reduction <add>, %12, %cst_7 [1] : vector<8x32xf32> to vector<8xf32>
    %14 = vector.shape_cast %13 : vector<8xf32> to vector<8x1xf32>
    %15 = math.log %14 : vector<8x1xf32>
    %16 = arith.addf %9, %15 : vector<8x1xf32>
    %17 = arith.mulf %12, %7 : vector<8x32xf32>
    %cst_8 = arith.constant dense<0.000000e+00> : vector<8xf32>
    %18 = vector.multi_reduction <add>, %17, %cst_8 [1] : vector<8x32xf32> to vector<8xf32>
    %19 = vector.shape_cast %18 : vector<8xf32> to vector<8x1xf32>
    %20 = arith.divf %19, %14 : vector<8x1xf32>
    %cst_9 = arith.constant dense<0xFF800000> : vector<8xf32>
    %21 = vector.multi_reduction <maximumf>, %4, %cst_9 [1] : vector<8x32xf32> to vector<8xf32>
    %22 = vector.shape_cast %21 : vector<8xf32> to vector<8x1xf32>
    %23 = vector.broadcast %22 : vector<8x1xf32> to vector<8x32xf32>
    %24 = arith.subf %4, %23 : vector<8x32xf32>
    %25 = math.exp %24 : vector<8x32xf32>
    %cst_10 = arith.constant dense<0.000000e+00> : vector<8xf32>
    %26 = vector.multi_reduction <add>, %25, %cst_10 [1] : vector<8x32xf32> to vector<8xf32>
    %27 = vector.shape_cast %26 : vector<8xf32> to vector<8x1xf32>
    %28 = math.log %27 : vector<8x1xf32>
    %29 = arith.addf %22, %28 : vector<8x1xf32>
    %30 = arith.addf %20, %29 : vector<8x1xf32>
    %31 = arith.subf %30, %16 : vector<8x1xf32>
    %cst_11 = arith.constant 2.000000e+00 : f32
    %32 = vector.broadcast %cst_11 : f32 to vector<8x1xf32>
    %33 = arith.mulf %32, %22 : vector<8x1xf32>
    %34 = arith.mulf %25, %25 : vector<8x32xf32>
    %cst_12 = arith.constant dense<0.000000e+00> : vector<8xf32>
    %35 = vector.multi_reduction <add>, %34, %cst_12 [1] : vector<8x32xf32> to vector<8xf32>
    %36 = vector.shape_cast %35 : vector<8xf32> to vector<8x1xf32>
    %37 = math.log %36 : vector<8x1xf32>
    %38 = arith.addf %33, %37 : vector<8x1xf32>
    %39 = tpu.iota {dimensions = array<i32: 1>} : vector<8x32xi32>
    %40 = vector.broadcast %2 : vector<8x1xi32> to vector<8x32xi32>
    %41 = arith.cmpi eq, %39, %40 : vector<8x32xi32>
    %cst_13 = arith.constant 0.000000e+00 : f32
    %42 = vector.broadcast %cst_13 : f32 to vector<8x32xf32>
    %43 = arith.select %41, %0, %42 : vector<8x32xi1>, vector<8x32xf32>
    %cst_14 = arith.constant dense<0.000000e+00> : vector<8xf32>
    %44 = vector.multi_reduction <add>, %43, %cst_14 [1] : vector<8x32xf32> to vector<8xf32>
    %45 = vector.shape_cast %44 : vector<8xf32> to vector<8x1xf32>
    %46 = arith.subf %38, %45 : vector<8x1xf32>
    %47 = vector.shape_cast %46 : vector<8x1xf32> to vector<1x8x1xf32>
    %cst_15 = arith.constant dense<0.000000e+00> : vector<1xf32>
    %48 = vector.multi_reduction <add>, %47, %cst_15 [1, 2] : vector<1x8x1xf32> to vector<1xf32>
    %49 = vector.shape_cast %48 : vector<1xf32> to vector<1x1x1xf32>
    %50 = vector.extract %49[0, 0, 0] : f32 from vector<1x1x1xf32>
    %51 = vector.shape_cast %31 : vector<8x1xf32> to vector<1x8x1xf32>
    %cst_16 = arith.constant dense<0.000000e+00> : vector<1xf32>
    %52 = vector.multi_reduction <add>, %51, %cst_16 [1, 2] : vector<1x8x1xf32> to vector<1xf32>
    %53 = vector.shape_cast %52 : vector<1xf32> to vector<1x1x1xf32>
    %54 = vector.extract %53[0, 0, 0] : f32 from vector<1x1x1xf32>
    %55 = tpu.iota {dimensions = array<i32: 0>} : vector<8x128xi32>
    %c0_i32 = arith.constant 0 : i32
    %56 = vector.broadcast %c0_i32 : i32 to vector<8x128xi32>
    %57 = arith.cmpi eq, %55, %56 : vector<8x128xi32>
    %c1_i32 = arith.constant 1 : i32
    %58 = vector.broadcast %c1_i32 : i32 to vector<8x128xi32>
    %59 = arith.cmpi eq, %55, %58 : vector<8x128xi32>
    %cst_17 = arith.constant 0.000000e+00 : f32
    %60 = vector.broadcast %54 : f32 to vector<8x128xf32>
    %61 = vector.broadcast %cst_17 : f32 to vector<8x128xf32>
    %62 = arith.select %59, %60, %61 : vector<8x128xi1>, vector<8x128xf32>
    %63 = vector.broadcast %50 : f32 to vector<8x128xf32>
    %64 = arith.select %57, %63, %62 : vector<8x128xi1>, vector<8x128xf32>
    %c0_18 = arith.constant 0 : index
    %c0_19 = arith.constant 0 : index
    %c0_20 = arith.constant 0 : index
    %65 = vector.load %arg4[%c0_18, %c0_19, %c0_20] : memref<1x8x128xf32, #tpu.memory_space<vmem>>, vector<1x8x128xf32>
    %66 = vector.shape_cast %65 : vector<1x8x128xf32> to vector<8x128xf32>
    %67 = vector.shape_cast %64 : vector<8x128xf32> to vector<1x8x128xf32>
    tpu.vector_store %arg4[%c0_18, %c0_19, %c0_20], %67 {strides = array<i32>} : memref<1x8x128xf32, #tpu.memory_space<vmem>>, vector<1x8x128xf32>,
    return
  }
  func.func @transform_0(%arg0: i32) -> (i32, i32) {
    %c0_i32 = arith.constant 0 : i32
    %c0_i32_0 = arith.constant 0 : i32
    return %arg0, %c0_i32 : i32, i32
  }
  func.func @transform_1(%arg0: i32) -> (i32, i32) {
    %c0_i32 = arith.constant 0 : i32
    %c0_i32_0 = arith.constant 0 : i32
    return %arg0, %c0_i32 : i32, i32
  }
  func.func @transform_2(%arg0: i32) -> (i32, i32) {
    %c0_i32 = arith.constant 0 : i32
    %c0_i32_0 = arith.constant 0 : i32
    return %arg0, %c0_i32 : i32, i32
  }
  func.func @transform_3(%arg0: i32) -> (i32, i32, i32) {
    %c0_i32 = arith.constant 0 : i32
    %c0_i32_0 = arith.constant 0 : i32
    %c0_i32_1 = arith.constant 0 : i32
    return %arg0, %c0_i32, %c0_i32_0 : i32, i32, i32
  }
}

</mosaic_0001>

<bundles_post_ra>
// kernel: tpu_custom_call.1
= control target key start
LH: loop header
LB: loop body
LE: loop exit
PB: predicated region body
PF: predicated region fallthrough
CT: control target
= control target key end

     0   :  { %8 = vsyncpa [#allocation3], 0  ;;  %s259_s0 = inlined_call_operand.vmem [shape: f32[8,32], index: 0, kind: input, shape index: {}]   ;;  %s260_s1 = inlined_call_operand.hbm [shape: f32[8,32], index: 1, kind: input, shape index: {}]   ;;  %s261_s2 = inlined_call_operand.vmem [shape: s32[8,1], index: 2, kind: input, shape index: {}]   ;;  %s262_s3 = inlined_call_operand.hbm [shape: f32[1,8,128], index: 3, kind: output, shape index: {}]  }
   0x1   :  { %9 = vsyncpa [#allocation4], 0  ;;  %s199_s12 = smov [#allocation2]   ;;  %s151_s16 = scalar_lea.hbm %s260_s1, 128 }
   0x2   :  { %s18_s13 = sshll.u32 %s199_s12, 4  ;;  %p152_p0 = scmp.ne.s32.totalorder %s260_s1, %s151_s16  ;;  %s19_s13 = int_to_ptr.vmem [resolvable:$true] %s18_s13 }
   0x3   :  { %p155_p1 = scmp.lt.u32.totalorder %s151_s16, %s260_s1 }
   0x5   :  { %p157_p2 = pnand %p155_p1, %p152_p0 }
   0x7   :  { %160 = shalt.err (!%p157_p2)
}
   0x8   :  { %s161_s21 = scalar_lea.vmem %s19_s13, 128  ;;  %p166_p4 = scmp.lt.s32.totalorder %s19_s13, %s19_s13 }
   0x9   :  { %p162_p3 = scmp.ne.s32.totalorder %s19_s13, %s161_s21  ;;  %p167_p5 = scmp.lt.s32.totalorder %s161_s21, %s161_s21 }
   0xb   :  { %p168_p6 = por %p167_p5, %p166_p4 }
   0xd   :  { %p169_p7 = pnand %p168_p6, %p162_p3 }
   0xf   :  { %172 = shalt.err (!%p169_p7)
}
  0x10   :  { %21 = dma.hbm_to_vmem [thread:$0]  %s260_s1, 128, %s19_s13, [#allocation3]  }
  0x11   :  { %195 = dma.done.wait [#allocation3], 128  }
  0x12   :  { %196 = vsyncadd [#allocation3], 4294967168  ;;  %v200_v0 = vmov 0   ;;  %v27_v1 = vld [vmem:[%s259_s0] sm:$0xff]  ;;  %vm33_vm0 = vcmask 261120   ;;  %v74_v16 = vlaneseq  ;;  %vm85_vm2 = vcmask 7168  }
  0x13   :  { %137 = vset.pattern.permute.xlu1 %v200_v0  ;;  %138 = vset.pattern.permute.xlu0 %v200_v0  ;;  %v28_v2 = vld [vmem:[#allocation2] sm:$0xff]  ;;  %v30_v4 = vmul.f32 0.5, %v27_v1  ;;  %s201_s1 = smov [#allocation5]  }
  0x14   :  { %v29_v3 = vld [vmem:[%s261_s2] sm:$0xff]  ;;  %v31_v5 = vmul.f32 0.5, %v28_v2  ;;  %v75_v21 = vand.u32 127, %v74_v16  ;;  %v107_v0 = vshrl.u32 %v74_v16, 7  ;;  %s121_s2 = sshll.u32 %s201_s1, 4  ;;  %s122_s2 = int_to_ptr.vmem [resolvable:$true] %s121_s2 }
  0x15   :  { %77 = vperm.xlu1 %137, %v29_v3   ;;  %v52_v6 = vsel %vm33_vm0, %v30_v4, -inf  ;;  %s173_s29 = scalar_lea.vmem %s122_s2, 128  ;;  %p178_p9 = scmp.lt.s32.totalorder %s122_s2, %s122_s2 }
  0x16   :  { %53 = vmax.xlane.f32.xlu0 %v52_v6  ;;  %v34_v7 = vsel %vm33_vm0, %v31_v5, -inf  ;;  %v32_v20 = vsub.f32 %v31_v5, %v30_v4  ;;  %vm109_vm3 = vcmp.eq.s32.totalorder %v107_v0, 1  ;;  %vm108_vm4 = vcmp.eq.s32.totalorder %v107_v0, 0  ;;  %p174_p8 = scmp.ne.s32.totalorder %s122_s2, %s173_s29  ;;  %p179_p10 = scmp.lt.s32.totalorder %s173_s29, %s173_s29 }
  0x18   :  { %p180_p11 = por %p179_p10, %p178_p9 }
  0x1a   :  { %35 = vmax.xlane.f32.xlu0 %v34_v7  ;;  %p181_p12 = pnand %p180_p11, %p174_p8 }
  0x94   :  { %v78_v22 = vpop.permute.xlu1 %77 }
  0x95   :  { %vm79_vm1 = vcmp.eq.s32.totalorder %v75_v21, %v78_v22 }
  0x96   :  { %v80_v25 = vsel %vm79_vm1, %v27_v1, 0.0 }
  0x97   :  { %v81_v27 = vsel %vm33_vm0, %v80_v25, 0.0 }
  0xa3   :  { %v54_v8 = vpop.xlane.xlu0 %53 }
  0xa4   :  { %v55_v9 = vsub.f32 %v30_v4, %v54_v8  ;;  %v66_v39 = vmul.f32 2.0, %v54_v8 }
  0xa6   :  { %v56_v10 = vmul.f32 1.442695, %v55_v9 }
  0xa7   :  { %v36_v11 = vpop.xlane.xlu0 %35 }
  0xa8   :  { %139 = vpow2.f32 %v56_v10  ;;  %v37_v12 = vsub.f32 %v31_v5, %v36_v11 }
  0xaa   :  { %v38_v13 = vmul.f32 1.442695, %v37_v12 }
  0xac   :  { %141 = vpow2.f32 %v38_v13 }
  0xb2   :  { %v140_v14 = vpop.eup %139 }
  0xb3   :  { %v58_v15 = vsel %vm33_vm0, %v140_v14, 0.0  ;;  %v67_v19 = vmul.f32 %v140_v14, %v140_v14 }
  0xb4   :  { %59 = vadd.xlane.f32.xlu1 %v58_v15 }
  0xb5   :  { %v68_v23 = vsel %vm33_vm0, %v67_v19, 0.0 }
  0xb6   :  { %v142_v17 = vpop.eup %141 }
  0xb7   :  { %v40_v18 = vsel %vm33_vm0, %v142_v17, 0.0  ;;  %v46_v24 = vmul.f32 %v142_v17, %v32_v20 }
  0xb8   :  { %41 = vadd.xlane.f32.xlu0 %v40_v18 }
  0xb9   :  { %v47_v26 = vsel %vm33_vm0, %v46_v24, 0.0 }
  0xbc   :  { %69 = vadd.xlane.f32.xlu0 %v68_v23 }
  0xc0   :  { %48 = vadd.xlane.f32.xlu0 %v47_v26 }
  0xc4   :  { %82 = vadd.xlane.f32.xlu0 %v81_v27 }
 0x141   :  { %v60_v28 = vpop.xlane.xlu1 %59 }
 0x142   :  { %143 = vlog2.f32 %v60_v28 }
 0x145   :  { %v42_v29 = vpop.xlane.xlu0 %41 }
 0x146   :  { %145 = vlog2.f32 %v42_v29 }
 0x147   :  { %147 = vrcp.f32 %v42_v29 }
 0x149   :  { %v70_v30 = vpop.xlane.xlu0 %69 }
 0x14a   :  { %149 = vlog2.f32 %v70_v30 }
 0x14c   :  { %v144_v31 = vpop.eup %143 }
 0x14d   :  { %v62_v34 = vmul.f32 0.6931472, %v144_v31  ;;  %v49_v35 = vpop.xlane.xlu0 %48 }
 0x14f   :  { %v63_v41 = vadd.f32 %v62_v34, %v54_v8 }
 0x150   :  { %v146_v32 = vpop.eup %145 }
 0x151   :  { %v148_v33 = vpop.eup %147  ;;  %v44_v36 = vmul.f32 0.6931472, %v146_v32  ;;  %v83_v42 = vpop.xlane.xlu0 %82 }
 0x152   :  { %v51_v37 = vmul.f32 %v148_v33, %v49_v35 }
 0x153   :  { %v45_v45 = vadd.f32 %v44_v36, %v36_v11 }
 0x154   :  { %v150_v38 = vpop.eup %149  ;;  %v64_v43 = vadd.f32 %v63_v41, %v51_v37 }
 0x155   :  { %v72_v40 = vmul.f32 0.6931472, %v150_v38 }
 0x156   :  { %v65_v48 = vsub.f32 %v64_v43, %v45_v45 }
 0x157   :  { %v73_v44 = vadd.f32 %v72_v40, %v66_v39 }
 0x158   :  { %v96_v49 = vsel %vm85_vm2, %v65_v48, 0.0 }
 0x159   :  { %v84_v46 = vsub.f32 %v73_v44, %v83_v42 }
 0x15b   :  { %v86_v47 = vsel %vm85_vm2, %v84_v46, 0.0 }
 0x15c   :  { %87 = vadd.xlane.f32.xlu0 %v86_v47 }
 0x160   :  { %97 = vadd.xlane.f32.xlu0 %v96_v49 }
 0x1e9   :  { %v88_v50 = vpop.xlane.xlu0 %87 }
 0x1ea   :  { %v89_v51 = vrot.slane %v88_v50, 4 }
 0x1ec   :  { %v90_v52 = vadd.f32 %v89_v51, %v88_v50 }
 0x1ed   :  { %v98_v53 = vpop.xlane.xlu0 %97 }
 0x1ee   :  { %v91_v54 = vrot.slane %v90_v52, 2  ;;  %v99_v55 = vrot.slane %v98_v53, 4 }
 0x1f0   :  { %v100_v56 = vadd.f32 %v99_v55, %v98_v53  ;;  %v92_v57 = vadd.f32 %v91_v54, %v90_v52 }
 0x1f2   :  { %v101_v58 = vrot.slane %v100_v56, 2  ;;  %v93_v59 = vrot.slane %v92_v57, 1 }
 0x1f4   :  { %v102_v60 = vadd.f32 %v101_v58, %v100_v56  ;;  %v94_v61 = vadd.f32 %v93_v59, %v92_v57 }
 0x1f6   :  { %130 = vpush %v94_v61  ;;  %v103_v62 = vrot.slane %v102_v60, 1 }
 0x1f8   :  { %v104_v63 = vadd.f32 %v103_v62, %v102_v60 }
 0x1fa   :  { %132 = vpush %v104_v63 }
 0x227   :  { %s131_s0 = spop %130 }
 0x228   :  { %v112_v2 = vstv %s131_s0 }
 0x22b   :  { %s133_s28 = spop %132 }
 0x22c   :  { %v110_v1 = vstv %s133_s28 }
 0x22d   :  { %v111_v3 = vsel %vm109_vm3, %v110_v1, 0.0 }
 0x22e   :  { %v113_v4 = vsel %vm108_vm4, %v112_v2, %v111_v3 }
 0x22f   :  { %114 = vst [vmem:[#allocation5] sm:$0xff] %v113_v4 }
 0x230   :  { %184 = shalt.err (!%p181_p12)
}
 0x231   :  { %s185_s5 = scalar_lea.hbm %s262_s3, 128 }
 0x232   :  { %p186_p13 = scmp.ne.s32.totalorder %s262_s3, %s185_s5  ;;  %p189_p0 = scmp.lt.u32.totalorder %s185_s5, %s262_s3 }
 0x234   :  { %p191_p1 = pnand %p189_p0, %p186_p13 }
 0x236   :  { %194 = shalt.err (!%p191_p1)
}
 0x237   :  { %124 = dma.vmem_to_hbm [thread:$0]  %s122_s2, 128, %s262_s3, [#allocation4]  }
 0x238   :  { %197 = dma.done.wait [#allocation4], 128  }
 0x239   :  { %198 = vsyncadd [#allocation4], 4294967168 }
 0x23a   :  { %128 = vsyncpa [#allocation3], 1 }
 0x23b   :  { %129 = vsyncpa [#allocation4], 1 }

</bundles_post_ra>
